<compile_context>
chip_gen: v7x
topology: tpu7x:2x2x1
jax: 0.10.0
libtpu: 0.0.40
codegen_flags: <defaults>
</compile_context>

<pallas_src>
import functools

import jax
import jax.numpy as jnp
from jax.experimental import pallas as pl
from jax.experimental.pallas import tpu as pltpu


def _decomp_kernel(x_ref, prev_ref, next_ref, res_ref, mean_ref, xpad_ref, *,
                   kernel_size, pad, tile):
    """One (batch-block, seq-tile) grid step.

    x_ref    : (bb, tile, D)           current seq tile of x
    prev_ref : (bb, halo, D)           last `halo` rows of the previous tile (valid when i > 0)
    next_ref : (bb, halo, D)           first `halo` rows of the next tile    (valid when i < n-1)
    res_ref  : (bb, tile, D)           x - moving_mean
    mean_ref : (bb, tile, D)           moving_mean
    xpad_ref : (bb, tile + 2*pad, D)   f32 scratch: locally replicate-padded tile
    """
    bb, _, d = x_ref.shape
    halo = prev_ref.shape[1]
    xf = x_ref[...].astype(jnp.float32)

    i = pl.program_id(1)
    n_i = pl.num_programs(1)

    # Middle of the padded scratch = the tile itself.
    xpad_ref[:, pad:pad + tile, :] = xf

    # Left halo: replicate row 0 at the global start, otherwise tail of prev tile.
    first_rows = jnp.broadcast_to(xf[:, 0:1, :], (bb, pad, d))
    prev_rows = prev_ref[:, halo - pad:halo, :].astype(jnp.float32)
    is_first = jnp.broadcast_to(i, (bb, pad, d)) == 0
    xpad_ref[:, 0:pad, :] = jnp.where(is_first, first_rows, prev_rows)

    # Right halo: replicate last row at the global end, otherwise head of next tile.
    last_rows = jnp.broadcast_to(xf[:, tile - 1:tile, :], (bb, pad, d))
    next_rows = next_ref[:, 0:pad, :].astype(jnp.float32)
    is_last = jnp.broadcast_to(i, (bb, pad, d)) == (n_i - 1)
    xpad_ref[:, tile + pad:tile + 2 * pad, :] = jnp.where(is_last, last_rows, next_rows)

    # Windowed sum via K static shifted slices of the padded scratch (VPU adds).
    acc = xpad_ref[:, 0:tile, :]
    for k in range(1, kernel_size):
        acc = acc + xpad_ref[:, k:k + tile, :]
    mean = acc * (1.0 / kernel_size)

    mean_ref[...] = mean.astype(mean_ref.dtype)
    res_ref[...] = (xf - mean).astype(res_ref.dtype)


def _choose_tile(seq_len, d, halo, max_tile_rows, tile_bytes_cap):
    """Largest multiple of `halo` that divides seq_len and fits the f32 budget."""
    best = None
    t = halo
    while t <= seq_len and t <= max_tile_rows:
        if seq_len % t == 0 and t * d * 4 <= tile_bytes_cap:
            best = t
        t += halo
    return best


def series_decomp(x, kernel_size, *, max_tile_rows=4096,
                  tile_bytes_cap=2 * 1024 * 1024,
                  batch_vmem_budget=12 * 1024 * 1024):
    """x: (B, L, D) -> (res, moving_mean), both (B, L, D)."""
    if kernel_size < 1 or kernel_size % 2 == 0:
        raise ValueError(
            "series_decomp requires an odd kernel_size (the PyTorch module only "
            "preserves seq_len for odd kernel_size).")
    b, seq_len, d = x.shape
    pad = (kernel_size - 1) // 2
    if pad == 0:                               # kernel_size == 1: mean is x itself
        return jnp.zeros_like(x), x

    halo = max(8, ((pad + 7) // 8) * 8)        # 8-aligned halo block height >= pad
    itemsize = jnp.dtype(x.dtype).itemsize

    tile = _choose_tile(seq_len, d, halo, max_tile_rows, tile_bytes_cap)
    if tile is None:
        tile = seq_len                          # single tile covering the whole sequence
    n_tiles = seq_len // tile
    tiles_per_block = max(tile // halo, 1)      # exact when n_tiles > 1
    n_halo_blocks = pl.cdiv(seq_len, halo)

    # Pack several batch rows per grid step (amortize per-step overhead) while
    # staying inside a conservative per-step VMEM budget (double-buffered
    # in/out tiles + halos + f32 scratch).
    per_b = ((3 * tile + 4 * halo) * d * itemsize) * 2 + (tile + 2 * pad) * d * 4
    bb = 1
    for cand in range(b, 0, -1):
        if b % cand == 0 and cand * per_b <= batch_vmem_budget:
            bb = cand
            break
    n_b = b // bb

    def main_map(bi, ii):
        return (bi, ii, 0)

    def prev_map(bi, ii):                       # last `halo` rows of the previous tile
        return (bi, jnp.maximum(ii * tiles_per_block - 1, 0), 0)

    def next_map(bi, ii):                       # first `halo` rows of the next tile
        return (bi, jnp.minimum((ii + 1) * tiles_per_block, n_halo_blocks - 1), 0)

    kernel = functools.partial(_decomp_kernel, kernel_size=kernel_size,
                               pad=pad, tile=tile)

    out_sds = jax.ShapeDtypeStruct((b, seq_len, d), x.dtype)
    cost = pl.CostEstimate(
        flops=b * seq_len * d * (kernel_size + 2),
        transcendentals=0,
        bytes_accessed=3 * b * seq_len * d * itemsize)

    res, mean = pl.pallas_call(
        kernel,
        out_shape=(out_sds, out_sds),
        grid_spec=pltpu.PrefetchScalarGridSpec(
            num_scalar_prefetch=0,
            grid=(n_b, n_tiles),
            in_specs=[
                pl.BlockSpec((bb, tile, d), main_map),
                pl.BlockSpec((bb, halo, d), prev_map),
                pl.BlockSpec((bb, halo, d), next_map),
            ],
            out_specs=[
                pl.BlockSpec((bb, tile, d), main_map),
                pl.BlockSpec((bb, tile, d), main_map),
            ],
            scratch_shapes=[pltpu.VMEM((bb, tile + 2 * pad, d), jnp.float32)],
        ),
        compiler_params=pltpu.CompilerParams(
            dimension_semantics=("parallel", "parallel"),
            vmem_limit_bytes=32 * 1024 * 1024),
        cost_estimate=cost,
    )(x, x, x)
    return res, mean


def _reference(x, kernel_size):
    """Pure-JAX reference matching the PyTorch module."""
    pad = (kernel_size - 1) // 2
    front = jnp.repeat(x[:, 0:1, :], pad, axis=1)
    end = jnp.repeat(x[:, -1:, :], pad, axis=1)
    x_pad = jnp.concatenate([front, x, end], axis=1)
    seq_len = x.shape[1]
    windows = jnp.stack(
        [x_pad[:, k:k + seq_len, :] for k in range(kernel_size)], axis=0)
    mean = jnp.mean(windows, axis=0)
    return x - mean, mean


if __name__ == "__main__":
    key = jax.random.PRNGKey(0)
    k1, k2, k3 = jax.random.split(key, 3)

    # Case 1: module-sized shapes (single seq tile, batch packed into one step).
    kernel_size = 5
    batch, seq_len, input_size = 2, 16, 8
    x = jax.random.normal(k1, (batch, seq_len, input_size), dtype=jnp.float32)
    res, mean = series_decomp(x, kernel_size)
    jax.block_until_ready((res, mean))
    res_ref, mean_ref = _reference(x, kernel_size)
    assert jnp.allclose(res, res_ref, atol=1e-5, rtol=1e-5)
    assert jnp.allclose(mean, mean_ref, atol=1e-5, rtol=1e-5)

    # Case 2: force the halo-tiled sequence path (4 seq tiles of 16 rows),
    # batch blocking on (2a) and per-batch grid (2b).
    kernel_size2 = 9
    x2 = jax.random.normal(k2, (2, 64, 8), dtype=jnp.float32)
    res2_ref, mean2_ref = _reference(x2, kernel_size2)
    res2a, mean2a = series_decomp(x2, kernel_size2, max_tile_rows=16)
    jax.block_until_ready((res2a, mean2a))
    assert jnp.allclose(res2a, res2_ref, atol=1e-5, rtol=1e-5)
    assert jnp.allclose(mean2a, mean2_ref, atol=1e-5, rtol=1e-5)
    res2b, mean2b = series_decomp(x2, kernel_size2, max_tile_rows=16,
                                  batch_vmem_budget=6000)   # forces bb = 1
    jax.block_until_ready((res2b, mean2b))
    assert jnp.allclose(res2b, res2_ref, atol=1e-5, rtol=1e-5)
    assert jnp.allclose(mean2b, mean2_ref, atol=1e-5, rtol=1e-5)

    # Case 3: bf16 input, lane-dense feature dim (D = 128).
    kernel_size3 = 3
    x3 = jax.random.normal(k3, (2, 32, 128), dtype=jnp.bfloat16)
    res3, mean3 = series_decomp(x3, kernel_size3)
    jax.block_until_ready((res3, mean3))
    res3_ref, mean3_ref = _reference(x3, kernel_size3)
    assert jnp.allclose(res3.astype(jnp.float32), res3_ref.astype(jnp.float32),
                        atol=6e-2, rtol=6e-2)
    assert jnp.allclose(mean3.astype(jnp.float32), mean3_ref.astype(jnp.float32),
                        atol=6e-2, rtol=6e-2)

    print("KERNEL_OK")
</pallas_src>

<mosaic_0001>
module attributes {stable_mosaic.version = 11 : i64} {
  func.func @_decomp_kernel(%arg0: i32, %arg1: i32, %arg2: memref<2x16x8xf32, #tpu.memory_space<vmem>>, %arg3: memref<2x8x8xf32, #tpu.memory_space<vmem>>, %arg4: memref<2x8x8xf32, #tpu.memory_space<vmem>>, %arg5: memref<2x16x8xf32, #tpu.memory_space<vmem>>, %arg6: memref<2x16x8xf32, #tpu.memory_space<vmem>>, %arg7: memref<2x20x8xf32, #tpu.memory_space<vmem>>) attributes {dimension_semantics = [#tpu.dimension_semantics<parallel>, #tpu.dimension_semantics<parallel>], iteration_bounds = array<i64: 1, 1>, scalar_prefetch = 0 : i64, scratch_operands = 1 : i64, tpu.core_type = #tpu.core_type<tc>, window_params = [{transform_indices = @transform_0, window_bounds = array<i64: 2, 16, 8>}, {transform_indices = @transform_1, window_bounds = array<i64: 2, 8, 8>}, {transform_indices = @transform_2, window_bounds = array<i64: 2, 8, 8>}, {transform_indices = @transform_3, window_bounds = array<i64: 2, 16, 8>}, {transform_indices = @transform_4, window_bounds = array<i64: 2, 16, 8>}]} {
    %c0 = arith.constant 0 : index
    %c0_0 = arith.constant 0 : index
    %c0_1 = arith.constant 0 : index
    %0 = vector.load %arg2[%c0, %c0_0, %c0_1] : memref<2x16x8xf32, #tpu.memory_space<vmem>>, vector<2x16x8xf32>
    %c0_2 = arith.constant 0 : index
    %c2 = arith.constant 2 : index
    %c0_3 = arith.constant 0 : index
    %1 = vector.load %arg7[%c0_2, %c2, %c0_3] : memref<2x20x8xf32, #tpu.memory_space<vmem>>, vector<2x16x8xf32>
    tpu.vector_store %arg7[%c0_2, %c2, %c0_3], %0 {strides = array<i32>} : memref<2x20x8xf32, #tpu.memory_space<vmem>>, vector<2x16x8xf32>,
    %2 = vector.extract_strided_slice %0 {offsets = [0, 0, 0], sizes = [2, 1, 8], strides = [1, 1, 1]} : vector<2x16x8xf32> to vector<2x1x8xf32>
    %3 = vector.shape_cast %2 : vector<2x1x8xf32> to vector<2x1x8xf32>
    %4 = vector.broadcast %3 : vector<2x1x8xf32> to vector<2x2x8xf32>
    %c0_4 = arith.constant 0 : index
    %c6 = arith.constant 6 : index
    %c0_5 = arith.constant 0 : index
    %5 = vector.load %arg3[%c0_4, %c6, %c0_5] : memref<2x8x8xf32, #tpu.memory_space<vmem>>, vector<2x2x8xf32>
    %6 = vector.broadcast %arg1 : i32 to vector<2x2x8xi32>
    %c0_i32 = arith.constant 0 : i32
    %7 = vector.broadcast %c0_i32 : i32 to vector<2x2x8xi32>
    %8 = arith.cmpi eq, %6, %7 : vector<2x2x8xi32>
    %9 = arith.select %8, %4, %5 : vector<2x2x8xi1>, vector<2x2x8xf32>
    %c0_6 = arith.constant 0 : index
    %c0_7 = arith.constant 0 : index
    %c0_8 = arith.constant 0 : index
    %10 = vector.load %arg7[%c0_6, %c0_7, %c0_8] : memref<2x20x8xf32, #tpu.memory_space<vmem>>, vector<2x2x8xf32>
    tpu.vector_store %arg7[%c0_6, %c0_7, %c0_8], %9 {strides = array<i32>} : memref<2x20x8xf32, #tpu.memory_space<vmem>>, vector<2x2x8xf32>,
    %11 = vector.extract_strided_slice %0 {offsets = [0, 15, 0], sizes = [2, 1, 8], strides = [1, 1, 1]} : vector<2x16x8xf32> to vector<2x1x8xf32>
    %12 = vector.shape_cast %11 : vector<2x1x8xf32> to vector<2x1x8xf32>
    %13 = vector.broadcast %12 : vector<2x1x8xf32> to vector<2x2x8xf32>
    %c0_9 = arith.constant 0 : index
    %c0_10 = arith.constant 0 : index
    %c0_11 = arith.constant 0 : index
    %14 = vector.load %arg4[%c0_9, %c0_10, %c0_11] : memref<2x8x8xf32, #tpu.memory_space<vmem>>, vector<2x2x8xf32>
    %15 = vector.broadcast %arg1 : i32 to vector<2x2x8xi32>
    %c0_i32_12 = arith.constant 0 : i32
    %16 = vector.broadcast %c0_i32_12 : i32 to vector<2x2x8xi32>
    %17 = arith.cmpi eq, %15, %16 : vector<2x2x8xi32>
    %18 = arith.select %17, %13, %14 : vector<2x2x8xi1>, vector<2x2x8xf32>
    %c0_13 = arith.constant 0 : index
    %c18 = arith.constant 18 : index
    %c0_14 = arith.constant 0 : index
    %19 = vector.load %arg7[%c0_13, %c18, %c0_14] : memref<2x20x8xf32, #tpu.memory_space<vmem>>, vector<2x2x8xf32>
    tpu.vector_store %arg7[%c0_13, %c18, %c0_14], %18 {strides = array<i32>} : memref<2x20x8xf32, #tpu.memory_space<vmem>>, vector<2x2x8xf32>,
    %c0_15 = arith.constant 0 : index
    %c0_16 = arith.constant 0 : index
    %c0_17 = arith.constant 0 : index
    %20 = vector.load %arg7[%c0_15, %c0_16, %c0_17] : memref<2x20x8xf32, #tpu.memory_space<vmem>>, vector<2x16x8xf32>
    %c0_18 = arith.constant 0 : index
    %c1 = arith.constant 1 : index
    %c0_19 = arith.constant 0 : index
    %21 = vector.load %arg7[%c0_18, %c1, %c0_19] : memref<2x20x8xf32, #tpu.memory_space<vmem>>, vector<2x16x8xf32>
    %22 = arith.addf %20, %21 : vector<2x16x8xf32>
    %c0_20 = arith.constant 0 : index
    %c2_21 = arith.constant 2 : index
    %c0_22 = arith.constant 0 : index
    %23 = vector.load %arg7[%c0_20, %c2_21, %c0_22] : memref<2x20x8xf32, #tpu.memory_space<vmem>>, vector<2x16x8xf32>
    %24 = arith.addf %22, %23 : vector<2x16x8xf32>
    %c0_23 = arith.constant 0 : index
    %c3 = arith.constant 3 : index
    %c0_24 = arith.constant 0 : index
    %25 = vector.load %arg7[%c0_23, %c3, %c0_24] : memref<2x20x8xf32, #tpu.memory_space<vmem>>, vector<2x16x8xf32>
    %26 = arith.addf %24, %25 : vector<2x16x8xf32>
    %c0_25 = arith.constant 0 : index
    %c4 = arith.constant 4 : index
    %c0_26 = arith.constant 0 : index
    %27 = vector.load %arg7[%c0_25, %c4, %c0_26] : memref<2x20x8xf32, #tpu.memory_space<vmem>>, vector<2x16x8xf32>
    %28 = arith.addf %26, %27 : vector<2x16x8xf32>
    %cst = arith.constant 2.000000e-01 : f32
    %29 = vector.broadcast %cst : f32 to vector<2x16x8xf32>
    %30 = arith.mulf %28, %29 : vector<2x16x8xf32>
    %c0_27 = arith.constant 0 : index
    %c0_28 = arith.constant 0 : index
    %c0_29 = arith.constant 0 : index
    %31 = vector.load %arg6[%c0_27, %c0_28, %c0_29] : memref<2x16x8xf32, #tpu.memory_space<vmem>>, vector<2x16x8xf32>
    tpu.vector_store %arg6[%c0_27, %c0_28, %c0_29], %30 {strides = array<i32>} : memref<2x16x8xf32, #tpu.memory_space<vmem>>, vector<2x16x8xf32>,
    %32 = arith.subf %0, %30 : vector<2x16x8xf32>
    %c0_30 = arith.constant 0 : index
    %c0_31 = arith.constant 0 : index
    %c0_32 = arith.constant 0 : index
    %33 = vector.load %arg5[%c0_30, %c0_31, %c0_32] : memref<2x16x8xf32, #tpu.memory_space<vmem>>, vector<2x16x8xf32>
    tpu.vector_store %arg5[%c0_30, %c0_31, %c0_32], %32 {strides = array<i32>} : memref<2x16x8xf32, #tpu.memory_space<vmem>>, vector<2x16x8xf32>,
    return
  }
  func.func @transform_0(%arg0: i32, %arg1: i32) -> (i32, i32, i32) {
    %c0_i32 = arith.constant 0 : i32
    %c0_i32_0 = arith.constant 0 : i32
    return %arg0, %arg1, %c0_i32 : i32, i32, i32
  }
  func.func @transform_1(%arg0: i32, %arg1: i32) -> (i32, i32, i32) {
    %c2_i32 = arith.constant 2 : i32
    %0 = arith.muli %arg1, %c2_i32 : i32
    %c1_i32 = arith.constant 1 : i32
    %1 = arith.subi %0, %c1_i32 : i32
    %c0_i32 = arith.constant 0 : i32
    %2 = arith.maxsi %1, %c0_i32 : i32
    %c0_i32_0 = arith.constant 0 : i32
    %c0_i32_1 = arith.constant 0 : i32
    return %arg0, %2, %c0_i32_0 : i32, i32, i32
  }
  func.func @transform_2(%arg0: i32, %arg1: i32) -> (i32, i32, i32) {
    %c1_i32 = arith.constant 1 : i32
    %0 = arith.addi %arg1, %c1_i32 : i32
    %c2_i32 = arith.constant 2 : i32
    %1 = arith.muli %0, %c2_i32 : i32
    %c1_i32_0 = arith.constant 1 : i32
    %2 = arith.minsi %1, %c1_i32_0 : i32
    %c0_i32 = arith.constant 0 : i32
    %c0_i32_1 = arith.constant 0 : i32
    return %arg0, %2, %c0_i32 : i32, i32, i32
  }
  func.func @transform_3(%arg0: i32, %arg1: i32) -> (i32, i32, i32) {
    %c0_i32 = arith.constant 0 : i32
    %c0_i32_0 = arith.constant 0 : i32
    return %arg0, %arg1, %c0_i32 : i32, i32, i32
  }
  func.func @transform_4(%arg0: i32, %arg1: i32) -> (i32, i32, i32) {
    %c0_i32 = arith.constant 0 : i32
    %c0_i32_0 = arith.constant 0 : i32
    return %arg0, %arg1, %c0_i32 : i32, i32, i32
  }
}

</mosaic_0001>

<bundles_post_ra>
// kernel: tpu_custom_call.1
= control target key start
LH: loop header
LB: loop body
LE: loop exit
PB: predicated region body
PF: predicated region fallthrough
CT: control target
= control target key end

     0   :  { %vm116_vm0 = vcmask 64512   ;;  %v121_v3 = vlaneseq  ;;  %vm135_vm1 = vcmask 58368   ;;  %s309_s0 = inlined_call_operand.vmem [shape: f32[2,16,8], index: 0, kind: input, shape index: {}]   ;;  %s310_s1 = inlined_call_operand.vmem [shape: f32[2,16,8], index: 1, kind: input, shape index: {}]   ;;  %s311_s2 = inlined_call_operand.vmem [shape: f32[2,16,8], index: 2, kind: input, shape index: {}]   ;;  %s312_s3 = inlined_call_operand.vmem [shape: f32[2,16,8], index: 3, kind: output, shape index: {0}]   ;;  %s313_s4 = inlined_call_operand.vmem [shape: f32[2,16,8], index: 4, kind: output, shape index: {1}]  }
   0x1   :  { %v254_v0 = vld [vmem:[%s309_s0] sm:$0xff]  ;;  %v113_v1 = vld [vmem:[%s309_s0 + $0x8] sm:$0xff]  ;;  %v262_v2 = vld [vmem:[%s309_s0 + $0x10] sm:$0xff] }
   0x2   :  { %117 = vst.msk [vmem:[#allocation2 + $0x2] sm:$0xff] %vm116_vm0, %v254_v0  ;;  %118 = vst.msk [vmem:[#allocation2 + $0xa] sm:$0xff] %vm116_vm0, %v113_v1  ;;  %v115_v4 = vld [vmem:[%s309_s0 + $0x18] sm:$0xff]  ;;  %v122_v5 = vshrl.u32 %v121_v3, 7 }
   0x3   :  { %119 = vst.msk [vmem:[#allocation2 + $0x1a] sm:$0xff] %vm116_vm0, %v262_v2  ;;  %120 = vst.msk [vmem:[#allocation2 + $0x22] sm:$0xff] %vm116_vm0, %v115_v4 }
   0x4   :  { %v123_v6 = vsub.s32 0, %v122_v5  ;;  %v140_v7 = vsub.s32 7, %v122_v5 }
   0x6   :  { %v124_v8 = vrot.slane %v254_v0, %v123_v6  ;;  %v128_v9 = vrot.slane %v262_v2, %v123_v6  ;;  %v141_v10 = vrot.slane %v113_v1, %v140_v7  ;;  %v145_v11 = vrot.slane %v115_v4, %v140_v7 }
   0x8   :  { %136 = vst.msk [vmem:[#allocation2] sm:$0x3] %vm135_vm1, %v124_v8  ;;  %137 = vst.msk [vmem:[#allocation2 + $0x18] sm:$0x3] %vm135_vm1, %v128_v9 }
   0x9   :  { %150 = vst.msk [vmem:[#allocation2 + $0x12] sm:$0x3] %vm135_vm1, %v141_v10  ;;  %151 = vst.msk [vmem:[#allocation2 + $0x2a] sm:$0x3] %vm135_vm1, %v145_v11  ;;  %v153_v12 = vld [vmem:[#allocation2 + $0x8] sm:$0xff] }
   0xa   :  { %v157_v13 = vld [vmem:[#allocation2 + $0x9] sm:$0xff]  ;;  %v155_v16 = vld [vmem:[#allocation2 + $0x20] sm:$0xff] }
   0xb   :  { %v165_v14 = vld [vmem:[#allocation2 + $0xa] sm:$0xff]  ;;  %v161_v15 = vadd.f32 %v157_v13, %v153_v12  ;;  %v159_v17 = vld [vmem:[#allocation2 + $0x21] sm:$0xff] }
   0xc   :  { %v167_v18 = vld [vmem:[#allocation2 + $0x22] sm:$0xff]  ;;  %v163_v19 = vadd.f32 %v159_v17, %v155_v16  ;;  %v166_v38 = vld [vmem:[#allocation2 + $0x1a] sm:$0xff] }
   0xd   :  { %v169_v20 = vadd.f32 %v165_v14, %v161_v15  ;;  %v164_v35 = vld [vmem:[#allocation2 + $0x2] sm:$0xff] }
   0xe   :  { %v171_v21 = vadd.f32 %v167_v18, %v163_v19  ;;  %v172_v41 = vld [vmem:[#allocation2 + $0x3] sm:$0xff]  ;;  %v174_v44 = vld [vmem:[#allocation2 + $0x1b] sm:$0xff] }
   0xf   :  { %v152_v27 = vld [vmem:[#allocation2] sm:$0xff]  ;;  %v154_v31 = vld [vmem:[#allocation2 + $0x18] sm:$0xff] }
  0x10   :  { %v173_v22 = vld [vmem:[#allocation2 + $0xb] sm:$0xff]  ;;  %v175_v23 = vld [vmem:[#allocation2 + $0x23] sm:$0xff]  ;;  %v158_v32 = vld [vmem:[#allocation2 + $0x19] sm:$0xff] }
  0x11   :  { %v177_v24 = vadd.f32 %v173_v22, %v169_v20  ;;  %v181_v25 = vld [vmem:[#allocation2 + $0xc] sm:$0xff]  ;;  %v179_v26 = vadd.f32 %v175_v23, %v171_v21  ;;  %v156_v28 = vld [vmem:[#allocation2 + $0x1] sm:$0xff]  ;;  %v162_v36 = vadd.f32 %v158_v32, %v154_v31 }
  0x12   :  { %v183_v29 = vld [vmem:[#allocation2 + $0x24] sm:$0xff]  ;;  %v160_v30 = vadd.f32 %v156_v28, %v152_v27  ;;  %v182_v50 = vld [vmem:[#allocation2 + $0x1c] sm:$0xff] }
  0x13   :  { %v185_v33 = vadd.f32 %v181_v25, %v177_v24  ;;  %v187_v34 = vadd.f32 %v183_v29, %v179_v26  ;;  %v170_v42 = vadd.f32 %v166_v38, %v162_v36  ;;  %v180_v47 = vld [vmem:[#allocation2 + $0x4] sm:$0xff] }
  0x14   :  { %v168_v37 = vadd.f32 %v164_v35, %v160_v30 }
  0x15   :  { %v189_v39 = vmul.f32 0.2, %v185_v33  ;;  %v191_v40 = vmul.f32 0.2, %v187_v34  ;;  %v178_v48 = vadd.f32 %v174_v44, %v170_v42 }
  0x16   :  { %v176_v43 = vadd.f32 %v172_v41, %v168_v37 }
  0x17   :  { %193 = vst.msk [vmem:[%s313_s4 + $0x8] sm:$0xff] %vm116_vm0, %v189_v39  ;;  %195 = vst.msk [vmem:[%s313_s4 + $0x18] sm:$0xff] %vm116_vm0, %v191_v40  ;;  %v197_v45 = vsub.f32 %v113_v1, %v189_v39  ;;  %v199_v46 = vsub.f32 %v115_v4, %v191_v40  ;;  %v186_v51 = vadd.f32 %v182_v50, %v178_v48 }
  0x18   :  { %v184_v49 = vadd.f32 %v180_v47, %v176_v43 }
  0x19   :  { %201 = vst.msk [vmem:[%s312_s3 + $0x8] sm:$0xff] %vm116_vm0, %v197_v45  ;;  %203 = vst.msk [vmem:[%s312_s3 + $0x18] sm:$0xff] %vm116_vm0, %v199_v46  ;;  %v190_v53 = vmul.f32 0.2, %v186_v51 }
  0x1a   :  { %v188_v52 = vmul.f32 0.2, %v184_v49 }
  0x1b   :  { %194 = vst.msk [vmem:[%s313_s4 + $0x10] sm:$0xff] %vm116_vm0, %v190_v53  ;;  %v198_v55 = vsub.f32 %v262_v2, %v190_v53 }
  0x1c   :  { %192 = vst.msk [vmem:[%s313_s4] sm:$0xff] %vm116_vm0, %v188_v52  ;;  %v196_v54 = vsub.f32 %v254_v0, %v188_v52 }
  0x1d   :  { %202 = vst.msk [vmem:[%s312_s3 + $0x10] sm:$0xff] %vm116_vm0, %v198_v55 }
  0x1e   :  { %200 = vst.msk [vmem:[%s312_s3] sm:$0xff] %vm116_vm0, %v196_v54 }

</bundles_post_ra>
